<compile_context>
chip_gen: v5e
topology: v5e:2x2
jax: 0.10.0
libtpu: 0.0.40
codegen_flags: <defaults>
</compile_context>

<pallas_src>
import functools

import jax
import jax.numpy as jnp
from jax import lax
from jax.experimental import pallas as pl
from jax.experimental.pallas import tpu as pltpu


def _round_up(x, m):
    return ((x + m - 1) // m) * m


def _linear_bias_kernel(x_ref, wt_ref, b_ref, o_ref):
    # o = x @ W_t + b ; f32 accumulation on the MXU, bias added in f32.
    acc = jnp.dot(x_ref[...].astype(wt_ref.dtype), wt_ref[...],
                  preferred_element_type=jnp.float32)
    o_ref[...] = (acc + b_ref[...]).astype(o_ref.dtype)


def prepare_policy_params(weight, bias, nvec, *, compute_dtype=jnp.float32,
                          n_align=128):
    """One-time parameter prep: transpose + lane padding of N only.

    Args:
      weight: (total_actions, input_dim) f32 -- PyTorch nn.Linear layout.
      bias:   (total_actions,) f32.
      nvec:   tuple of per-head action counts; sum(nvec) must equal
              weight.shape[0] (correctness check from review).
      compute_dtype: MXU operand dtype (f32, or bf16 to halve weight traffic
                     -- worthwhile on v5e too, not only v6e/v7x).
      n_align: lane alignment for the padded N dim.  128 everywhere; 256 for
               bf16 on v6e/v7x (2x256x256 MXU); keep 128 on v5e.

    Returns:
      wt_padded: (input_dim, N_pad) compute_dtype, zero-padded, transposed.
      b_padded:  (1, N_pad) f32, zero-padded.
    """
    total, input_dim = weight.shape
    assert bias.shape == (total,), (bias.shape, total)
    assert int(sum(nvec)) == total, (tuple(nvec), total)
    n_pad = _round_up(total, n_align)
    wt_padded = jnp.zeros((input_dim, n_pad), compute_dtype)
    wt_padded = wt_padded.at[:, :total].set(weight.T.astype(compute_dtype))
    b_padded = jnp.zeros((1, n_pad), jnp.float32)
    b_padded = b_padded.at[:, :total].set(bias.astype(jnp.float32))
    return wt_padded, b_padded


@functools.partial(jax.jit,
                   static_argnames=("nvec", "batch_tile", "out_dtype"))
def multi_discrete_policy_forward(x, wt_padded, b_padded, *, nvec,
                                  batch_tile=512, out_dtype=jnp.float32):
    """Pallas implementation of MultiDiscretePolicy.forward.

    Args:
      x:         (batch, input_dim) array (any float dtype; cast in-kernel).
      wt_padded: (input_dim, N_pad) pre-transposed padded weight.
      b_padded:  (1, N_pad) padded f32 bias.
      nvec:      tuple of ints (action-space sizes), sum(nvec) <= N_pad.
      batch_tile: max rows per grid step (balanced across the grid).
      out_dtype: dtype of the returned logits (bfloat16 halves output HBM
                 traffic on this memory-bound kernel).

    Returns:
      tuple of arrays; the i-th has shape (batch, nvec[i]).
    """
    batch, k = x.shape
    k_w, n_pad = wt_padded.shape
    assert k == k_w, (k, k_w)
    assert b_padded.shape == (1, n_pad), b_padded.shape
    total = int(sum(nvec))
    assert total <= n_pad, (total, n_pad)
    compute_dtype = wt_padded.dtype

    x_bytes = jnp.dtype(x.dtype).itemsize
    c_bytes = jnp.dtype(compute_dtype).itemsize
    o_bytes = jnp.dtype(out_dtype).itemsize

    # bf16 packs (16, 128) per vreg: prefer 16-row batch tiles when possible.
    sublane = 16 if (compute_dtype == jnp.bfloat16 and batch >= 16) else 8

    # Balanced batch tiling; a full-extent block is used when batch is tiny
    # (full extent is always a legal block shape, no padding needed).
    num_m = max(1, pl.cdiv(batch, batch_tile))
    tile_m = _round_up(pl.cdiv(batch, num_m), sublane)
    if tile_m > batch:
        tile_m = batch

    # Column tiling over N bounds the resident weight tile (v7x: 64 MiB VMEM)
    # and keeps stores lane-dense (multiples of 128 lanes).
    tile_n = min(n_pad, 512)

    # Guarantee >= 2 grid blocks when possible so both v7x TensorCores get
    # work (harmless on single-core v5e/v6e).
    if (pl.cdiv(batch, tile_m) * pl.cdiv(n_pad, tile_n) == 1
            and batch >= 2 * sublane):
        tile_m = _round_up(pl.cdiv(batch, 2), sublane)

    # Fit the (double-buffered) tile footprint into this chip's VMEM; shrink
    # tiles rather than over-requesting (v7x has only 64 MiB per TensorCore).
    try:
        vmem_cap = int(pltpu.get_tpu_info().vmem_capacity_bytes)
    except Exception:  # conservative fallback (v7x per-TC capacity)
        vmem_cap = 64 * 1024 * 1024
    budget = vmem_cap - (8 << 20)

    def _vmem_needed(tm, tn):
        return (2 * tm * k * x_bytes        # x tile (double-buffered)
                + 2 * k * tn * c_bytes      # weight column tile
                + 2 * 8 * tn * 4            # bias tile (sublane padded)
                + 2 * tm * tn * o_bytes)    # output tile

    while _vmem_needed(tile_m, tile_n) > budget:
        if tile_n > 128:
            tile_n = max(128, _round_up(tile_n // 2, 128))
        elif tile_m > sublane:
            tile_m = max(sublane, _round_up(tile_m // 2, sublane))
        else:
            break

    grid_m = pl.cdiv(batch, tile_m)
    grid_n = pl.cdiv(n_pad, tile_n)
    vmem_limit = int(min(budget,
                         max(_vmem_needed(tile_m, tile_n) + (4 << 20),
                             32 << 20)))

    cost = pl.CostEstimate(
        flops=2 * batch * k * n_pad,
        transcendentals=0,
        bytes_accessed=(batch * k * x_bytes + k * n_pad * c_bytes
                        + n_pad * 4 + batch * n_pad * o_bytes),
    )

    # Grid: (N tiles, batch tiles) -- batch innermost so each weight column
    # tile stays VMEM-resident across all batch tiles before moving to the
    # next column tile.
    logits_padded = pl.pallas_call(
        _linear_bias_kernel,
        out_shape=jax.ShapeDtypeStruct((batch, n_pad), out_dtype),
        grid_spec=pl.GridSpec(
            grid=(grid_n, grid_m),
            in_specs=[
                pl.BlockSpec((tile_m, k), lambda jn, im: (im, 0)),   # x
                pl.BlockSpec((k, tile_n), lambda jn, im: (0, jn)),   # weight
                pl.BlockSpec((1, tile_n), lambda jn, im: (0, jn)),   # bias
            ],
            out_specs=pl.BlockSpec((tile_m, tile_n),
                                   lambda jn, im: (im, jn)),
        ),
        compiler_params=pltpu.CompilerParams(
            dimension_semantics=("parallel", "parallel"),
            vmem_limit_bytes=vmem_limit,
        ),
        cost_estimate=cost,
    )(x, wt_padded, b_padded)
    # NOTE: the weight/bias specs could additionally be single-buffered via
    # pipeline_mode=pl.Buffered(1) to halve their resident footprint; the
    # VMEM fit above already budgets for the default double buffer, and the
    # pipeliner skips re-DMA for unchanged block indices.

    # torch.split equivalent: one lax.slice per head straight off the padded
    # logits (no intermediate (batch, total) copy).
    splits, off = [], 0
    for n in nvec:
        splits.append(lax.slice(logits_padded, (0, off), (batch, off + n)))
        off += n
    return tuple(splits)


if __name__ == "__main__":
    # Small shapes consistent with the module's forward.
    batch = 8
    input_dim = 32
    nvec = (3, 4, 5)                      # action_space.nvec
    total = sum(nvec)

    key = jax.random.PRNGKey(0)
    kx, kw, kb, kx2 = jax.random.split(key, 4)

    x = jax.random.normal(kx, (batch, input_dim), dtype=jnp.float32)
    # Deterministic parameter init (mimics nn.Linear uniform bounds).
    bound = 1.0 / (input_dim ** 0.5)
    weight = jax.random.uniform(kw, (total, input_dim), jnp.float32,
                                minval=-bound, maxval=bound)
    bias = jax.random.uniform(kb, (total,), jnp.float32,
                              minval=-bound, maxval=bound)

    def check(outs, xx, atol, rtol):
        ref_logits = xx @ weight.T + bias
        off = 0
        for out, n in zip(outs, nvec):
            assert out.shape == (xx.shape[0], n), out.shape
            assert jnp.allclose(out.astype(jnp.float32),
                                ref_logits[:, off:off + n],
                                atol=atol, rtol=rtol)
            off += n

    # --- f32 operand path (exact-tolerance check) --------------------------
    wt_f32, b_f32 = prepare_policy_params(weight, bias, nvec,
                                          compute_dtype=jnp.float32)
    outs = jax.block_until_ready(
        multi_discrete_policy_forward(x, wt_f32, b_f32, nvec=nvec))
    check(outs, x, atol=1e-5, rtol=1e-5)

    # --- larger batch: exercises balanced tiling + masked partial block ----
    x_big = jax.random.normal(kx2, (40, input_dim), dtype=jnp.float32)
    outs_big = jax.block_until_ready(
        multi_discrete_policy_forward(x_big, wt_f32, b_f32, nvec=nvec))
    check(outs_big, x_big, atol=1e-5, rtol=1e-5)

    # --- bf16 operand path (f32 accumulation; x cast in-kernel) ------------
    wt_bf16, b_bf16 = prepare_policy_params(weight, bias, nvec,
                                            compute_dtype=jnp.bfloat16)
    outs_bf16 = jax.block_until_ready(
        multi_discrete_policy_forward(x, wt_bf16, b_bf16, nvec=nvec))
    check(outs_bf16, x, atol=5e-2, rtol=5e-2)

    print("KERNEL_OK")
</pallas_src>

<mosaic_0001>
module attributes {stable_mosaic.version = 11 : i64} {
  func.func @_linear_bias_kernel(%arg0: i32, %arg1: i32, %arg2: memref<8x32xf32, #tpu.memory_space<vmem>>, %arg3: memref<32x128xf32, #tpu.memory_space<vmem>>, %arg4: memref<1x128xf32, #tpu.memory_space<vmem>>, %arg5: memref<8x128xf32, #tpu.memory_space<vmem>>) attributes {dimension_semantics = [#tpu.dimension_semantics<parallel>, #tpu.dimension_semantics<parallel>], iteration_bounds = array<i64: 1, 1>, scalar_prefetch = 0 : i64, scratch_operands = 0 : i64, tpu.core_type = #tpu.core_type<tc>, window_params = [{transform_indices = @transform_0, window_bounds = array<i64: 8, 32>}, {transform_indices = @transform_1, window_bounds = array<i64: 32, 128>}, {transform_indices = @transform_2, window_bounds = array<i64: 1, 128>}, {transform_indices = @transform_3, window_bounds = array<i64: 8, 128>}]} {
    %c0 = arith.constant 0 : index
    %c0_0 = arith.constant 0 : index
    %0 = vector.load %arg2[%c0, %c0_0] : memref<8x32xf32, #tpu.memory_space<vmem>>, vector<8x32xf32>
    %c0_1 = arith.constant 0 : index
    %c0_2 = arith.constant 0 : index
    %1 = vector.load %arg3[%c0_1, %c0_2] : memref<32x128xf32, #tpu.memory_space<vmem>>, vector<32x128xf32>
    %cst = arith.constant dense<0.000000e+00> : vector<8x128xf32>
    %2 = tpu.matmul %0, %1, %cst {dimension_numbers = #tpu.dot_dimension_numbers<[1], [0], [0], [1], [0, 0, 1, 1], [], []>} : vector<8x32xf32>, vector<32x128xf32>, vector<8x128xf32> -> vector<8x128xf32>
    %c0_3 = arith.constant 0 : index
    %c0_4 = arith.constant 0 : index
    %3 = vector.load %arg4[%c0_3, %c0_4] : memref<1x128xf32, #tpu.memory_space<vmem>>, vector<1x128xf32>
    %4 = vector.broadcast %3 : vector<1x128xf32> to vector<8x128xf32>
    %5 = arith.addf %2, %4 : vector<8x128xf32>
    %c0_5 = arith.constant 0 : index
    %c0_6 = arith.constant 0 : index
    %6 = vector.load %arg5[%c0_5, %c0_6] : memref<8x128xf32, #tpu.memory_space<vmem>>, vector<8x128xf32>
    tpu.vector_store %arg5[%c0_5, %c0_6], %5 {strides = array<i32>} : memref<8x128xf32, #tpu.memory_space<vmem>>, vector<8x128xf32>,
    return
  }
  func.func @transform_0(%arg0: i32, %arg1: i32) -> (i32, i32) {
    %c0_i32 = arith.constant 0 : i32
    %c0_i32_0 = arith.constant 0 : i32
    return %arg1, %c0_i32 : i32, i32
  }
  func.func @transform_1(%arg0: i32, %arg1: i32) -> (i32, i32) {
    %c0_i32 = arith.constant 0 : i32
    %c0_i32_0 = arith.constant 0 : i32
    return %c0_i32, %arg0 : i32, i32
  }
  func.func @transform_2(%arg0: i32, %arg1: i32) -> (i32, i32) {
    %c0_i32 = arith.constant 0 : i32
    %c0_i32_0 = arith.constant 0 : i32
    return %c0_i32, %arg0 : i32, i32
  }
  func.func @transform_3(%arg0: i32, %arg1: i32) -> (i32, i32) {
    %c0_i32 = arith.constant 0 : i32
    return %arg1, %arg0 : i32, i32
  }
}

</mosaic_0001>

<bundles_post_ra>
// kernel: multi_discrete_policy_forward.1
= control target key start
LH: loop header
LB: loop body
LE: loop exit
PB: predicated region body
PF: predicated region fallthrough
CT: control target
= control target key end

     0   :  { %8 = vsyncpa [#allocation3], 0  ;;  %s178_s0 = inlined_call_operand.hbm [shape: f32[8,32], index: 0, kind: input, shape index: {}]   ;;  %s179_s1 = inlined_call_operand.hbm [shape: f32[32,128], index: 1, kind: input, shape index: {}]   ;;  %s180_s2 = inlined_call_operand.vmem [shape: f32[1,128], index: 2, kind: input, shape index: {}]   ;;  %s181_s3 = inlined_call_operand.vmem [shape: f32[8,128], index: 3, kind: output, shape index: {}]  }
   0x1   :  { %s15_s14 = sshll.u32 %s178_s0, 4  ;;  %s16_s14 = int_to_ptr.hbm [resolvable:$true] %s15_s14 }
   0x2   :  { %9 = vsyncpa [#allocation5], 0  ;;  %s142_s15 = smov [#allocation2]   ;;  %s25_s19 = sshll.u32 %s179_s1, 4  ;;  %s26_s19 = int_to_ptr.hbm [resolvable:$true] %s25_s19 }
   0x3   :  { %s17_s16 = sshll.u32 %s142_s15, 4  ;;  %s143_s20 = smov [#allocation4]   ;;  %s18_s16 = int_to_ptr.vmem [resolvable:$true] %s17_s16 }
   0x4   :  { %20 = dma.hbm_to_vmem [thread:$0]  %s16_s14, 128, %s18_s16, [#allocation3]  }
   0x5   :  { %s27_s21 = sshll.u32 %s143_s20, 4  ;;  %s144_s22 = smov 128   ;;  %s28_s21 = int_to_ptr.vmem [resolvable:$true] %s27_s21 }
   0x6   :  { %s145_s23 = smov 8  }
   0x7   :  { %33 = dma.hbm_to_vmem [thread:$0]  %s26_s19, 512, %s28_s21, [#allocation5], %s144_s22, %s144_s22, %s145_s23  }
   0x8   :  { %138 = dma.done.wait [#allocation3], 128  }
   0x9   :  { %139 = vsyncadd [#allocation3], 4294967168 }
   0xa   :  { %140 = dma.done.wait [#allocation5], 512  }
   0xb   :  { %141 = vsyncadd [#allocation5], 4294966784  ;;  %v48_v0 = vld [vmem:[#allocation4 + $0x18] sm:$0xff]  ;;  %v47_v1 = vld [vmem:[#allocation4 + $0x10] sm:$0xff]  ;;  %vm53_vm0 = vcmask 261120  }
   0xc   :  { %69 = vmatpush.msra.mxu0 %v48_v0  ;;  %v46_v2 = vld [vmem:[#allocation4 + $0x8] sm:$0xff]  ;;  %v45_v3 = vld [vmem:[#allocation4] sm:$0xff]  ;;  %v44_v4 = vld [vmem:[#allocation2] sm:$0xff] }
   0xd   :  { %v89_v5 = vld [vmem:[%s180_s2] ss:$0 sm:$0xff] }
   0xe   :  { %70 = vmatpush.msra.mxu0 %v47_v1 }
  0x10   :  { %71 = vmatpush.msra.mxu0 %v46_v2 }
  0x12   :  { %72 = vmatpush.msra.mxu0 %v45_v3 }
  0x13   :  { %84 = vmatmul.msk.f32.vlgmr.msra.gmra.mxu0 %vm53_vm0, %v44_v4 }
  0x90   :  { %v74_v6 = vpop.f32.mrf.mxu0 }
  0x91   :  { %v75_v7 = vadd.f32 %v89_v5, %v74_v6 }
  0x93   :  { %77 = vst [vmem:[%s181_s3] sm:$0xff] %v75_v7 }
  0x94   :  { %82 = vsyncpa [#allocation3], 1 }
  0x95   :  { %83 = vsyncpa [#allocation5], 1 }

</bundles_post_ra>
